<compile_context>
chip_gen: v6e
topology: v6e:2x2x1
jax: 0.10.0
libtpu: 0.0.40
codegen_flags: <defaults>
</compile_context>

<pallas_src>
import jax
import jax.numpy as jnp
from jax.experimental import pallas as pl
from jax.experimental.pallas import tpu as pltpu


def _linear_add_kernel(x_ref, w_ref, b_ref, y_ref, o_ref):
    # v2 = x @ W (MXU, f32 accumulate); v3 = v2 + b + y written straight out.
    v2 = jnp.dot(x_ref[...], w_ref[...], preferred_element_type=jnp.float32)
    o_ref[...] = (v2 + b_ref[...] + y_ref[...]).astype(o_ref.dtype)


def model_forward(x, w_t, b, y):
    M, K = x.shape
    _, N = w_t.shape
    b2d = b.reshape(1, N)

    vmem_spec = pl.BlockSpec(memory_space=pltpu.MemorySpace.VMEM)
    return pl.pallas_call(
        _linear_add_kernel,
        out_shape=jax.ShapeDtypeStruct((M, N), jnp.float32),
        in_specs=[vmem_spec, vmem_spec, vmem_spec, vmem_spec],
        out_specs=vmem_spec,
        # y (arg index 3) has the same shape/dtype as the output -> reuse its
        # HBM buffer for the result.
        input_output_aliases={3: 0},
    )(x, w_t, b2d, y)


if __name__ == "__main__":
    key = jax.random.PRNGKey(0)
    k_x, k_y, k_w, k_b = jax.random.split(key, 4)

    M, K, N = 16, 16, 8  # batch=16, in_features=16, out_features=8

    x = jax.random.normal(k_x, (M, K), dtype=jnp.float32)
    y = jax.random.normal(k_y, (M, N), dtype=jnp.float32)

    # Deterministic Linear(16, 8) params (PyTorch-style uniform init bounds).
    bound = 1.0 / (K ** 0.5)
    w = jax.random.uniform(k_w, (N, K), minval=-bound, maxval=bound,
                           dtype=jnp.float32)   # PyTorch layout (out, in)
    b = jax.random.uniform(k_b, (N,), minval=-bound, maxval=bound,
                           dtype=jnp.float32)
    w_t = w.T  # (K, N) so the kernel computes x @ W.T

    # Reference computed BEFORE the kernel call: y's buffer is donated to the
    # kernel output via input_output_aliases.
    ref = (x * 1.0) @ w.T + b + y

    out = model_forward(x, w_t, b, y)
    jax.block_until_ready(out)

    assert out.shape == (M, N)
    assert jnp.allclose(out, ref, atol=1e-5, rtol=1e-5)

    print("KERNEL_OK")
</pallas_src>

<mosaic_0001>
module attributes {stable_mosaic.version = 11 : i64} {
  func.func @_linear_add_kernel(%arg0: memref<16x16xf32, #tpu.memory_space<vmem>>, %arg1: memref<16x8xf32, #tpu.memory_space<vmem>>, %arg2: memref<1x8xf32, #tpu.memory_space<vmem>>, %arg3: memref<16x8xf32, #tpu.memory_space<vmem>>, %arg4: memref<16x8xf32, #tpu.memory_space<vmem>>) attributes {dimension_semantics = [], scalar_prefetch = 0 : i64, scratch_operands = 0 : i64, tpu.core_type = #tpu.core_type<tc>} {
    %c0 = arith.constant 0 : index
    %c0_0 = arith.constant 0 : index
    %0 = vector.load %arg0[%c0, %c0_0] : memref<16x16xf32, #tpu.memory_space<vmem>>, vector<16x16xf32>
    %c0_1 = arith.constant 0 : index
    %c0_2 = arith.constant 0 : index
    %1 = vector.load %arg1[%c0_1, %c0_2] : memref<16x8xf32, #tpu.memory_space<vmem>>, vector<16x8xf32>
    %cst = arith.constant dense<0.000000e+00> : vector<16x8xf32>
    %2 = tpu.matmul %0, %1, %cst {dimension_numbers = #tpu.dot_dimension_numbers<[1], [0], [0], [1], [0, 0, 1, 1], [], []>} : vector<16x16xf32>, vector<16x8xf32>, vector<16x8xf32> -> vector<16x8xf32>
    %c0_3 = arith.constant 0 : index
    %c0_4 = arith.constant 0 : index
    %3 = vector.load %arg2[%c0_3, %c0_4] : memref<1x8xf32, #tpu.memory_space<vmem>>, vector<1x8xf32>
    %4 = vector.broadcast %3 : vector<1x8xf32> to vector<16x8xf32>
    %5 = arith.addf %2, %4 : vector<16x8xf32>
    %c0_5 = arith.constant 0 : index
    %c0_6 = arith.constant 0 : index
    %6 = vector.load %arg3[%c0_5, %c0_6] : memref<16x8xf32, #tpu.memory_space<vmem>>, vector<16x8xf32>
    %7 = arith.addf %5, %6 : vector<16x8xf32>
    %c0_7 = arith.constant 0 : index
    %c0_8 = arith.constant 0 : index
    %8 = vector.load %arg4[%c0_7, %c0_8] : memref<16x8xf32, #tpu.memory_space<vmem>>, vector<16x8xf32>
    tpu.vector_store %arg4[%c0_7, %c0_8], %7 {strides = array<i32>} : memref<16x8xf32, #tpu.memory_space<vmem>>, vector<16x8xf32>,
    return
  }
}

</mosaic_0001>

<bundles_post_ra>
// kernel: tpu_custom_call.1
= control target key start
LH: loop header
LB: loop body
LE: loop exit
PB: predicated region body
PF: predicated region fallthrough
CT: control target
= control target key end

     0   :  { %vm28_vm0 = vcmask 130048   ;;  %vm114_vm1 = vcmask 64512   ;;  %s187_s1 = inlined_call_operand.vmem [shape: f32[16,8], index: 1, kind: input, shape index: {}]   ;;  %s188_s0 = inlined_call_operand.vmem [shape: f32[16,16], index: 0, kind: input, shape index: {}]   ;;  %s189_s2 = inlined_call_operand.vmem [shape: f32[1,8], index: 2, kind: input, shape index: {}]   ;;  %s190_s3 = inlined_call_operand.vmem [shape: f32[16,8], index: 3, kind: input, shape index: {}, may-alias: {3,4}]   ;;  %s191_s4 = inlined_call_operand.vmem [shape: f32[16,8], index: 4, kind: output, shape index: {}, may-alias: {3,4}]  }
   0x1   :  { %v20_v0 = vld [vmem:[%s187_s1 + $0x8] sm:$0xff]  ;;  %v19_v1 = vld [vmem:[%s187_s1] sm:$0xff] }
   0x2   :  { %v17_v2 = vld [vmem:[%s188_s0] sm:$0xff]  ;;  %128 = vmatprep.subr.mxu0 %v20_v0  ;;  %v18_v3 = vld [vmem:[%s188_s0 + $0x8] sm:$0xff] }
   0x3   :  { %132 = vmatprep.mubr.msk.f32.mxu0 %vm28_vm0, %v17_v2  ;;  %129 = vmatpush3.msra.mxu0 %v20_v0  ;;  %v121_v4 = vld [vmem:[%s189_s2] ss:$0 sm:$0xff]  ;;  %v111_v6 = vld [vmem:[%s190_s3 + $0x8] sm:$0xff] }
   0x4   :  { %130 = vmatprep.subr.mxu0 %v19_v1  ;;  %v110_v9 = vld [vmem:[%s190_s3] sm:$0xff] }
   0x5   :  { %131 = vmatpush3.msra.mxu0 %v19_v1 }
   0x6   :  { %133 = vmatmul.mubr.msk.f32.vlgmr.msra.gmra.mxu0 %vm28_vm0, %v18_v3 }
  0xc6   :  { %v134_v5 = vpop.f32.mrf.mxu0 }
  0xc7   :  { %v107_v7 = vadd.f32 %v134_v5, %v121_v4 }
  0xc8   :  { %v101_v8 = vpop.f32.mrf.mxu0 }
  0xc9   :  { %v113_v10 = vadd.f32 %v111_v6, %v107_v7  ;;  %v102_v11 = vadd.f32 %v121_v4, %v101_v8 }
  0xcb   :  { %116 = vst.msk [vmem:[%s191_s4 + $0x8] sm:$0xff] %vm114_vm1, %v113_v10  ;;  %v112_v12 = vadd.f32 %v110_v9, %v102_v11 }
  0xcd   :  { %115 = vst.msk [vmem:[%s191_s4] sm:$0xff] %vm114_vm1, %v112_v12 }

</bundles_post_ra>
